<compile_context>
chip_gen: v7x
topology: tpu7x:2x2x1
jax: 0.10.0
libtpu: 0.0.40
codegen_flags: <defaults>
</compile_context>

<pallas_src>
import functools
import math

import jax
import jax.numpy as jnp
from jax.experimental import pallas as pl
from jax.experimental.pallas import tpu as pltpu


def _stencil3x3_kernel(b_ref, coeff_ref, x_ref, o_ref, p_ref, *, H, W, PAD):
    # b_ref     : SMEM (1,)        f32  bias
    # coeff_ref : VMEM (9, H*W)    f32  weight[i,j] * per-tap validity mask
    # x_ref     : VMEM (nb, H*W)   f32  nb flattened (H, W) planes
    # o_ref     : VMEM (nb, H*W)   f32  output slab
    # p_ref     : VMEM (nb, L)     f32  scratch: payload at lane offset PAD,
    #                                   zero halo of width W+1 on both sides
    HW = H * W
    nb = x_ref.shape[0]

    # Refresh the two halo strips every step (cheap, and megacore-safe: no
    # reliance on a program_id==0 init), then drop the payload at a
    # lane-aligned offset so the big store is dense/unshifted.
    zeros_strip = jnp.zeros((nb, W + 1), dtype=jnp.float32)
    p_ref[:, PAD - (W + 1):PAD] = zeros_strip
    p_ref[:, PAD + HW:PAD + HW + (W + 1)] = zeros_strip
    p_ref[:, PAD:PAD + HW] = x_ref[...]

    # out[:, f] = bias + sum_{di,dj} coeff[k, f] * payload[:, f + di*W + dj]
    # coeff already carries the 3x3 weight and zeroes every out-of-range tap,
    # so the big-VPU work is exactly 9 mul + 9 add per element.
    acc = jnp.full((nb, HW), b_ref[0], dtype=jnp.float32)
    for di in (-1, 0, 1):
        for dj in (-1, 0, 1):
            k = (di + 1) * 3 + (dj + 1)
            base = PAD + di * W + dj
            acc = acc + coeff_ref[k:k + 1, :] * p_ref[:, base:base + HW]
    o_ref[...] = acc.astype(o_ref.dtype)


def three_conv_forward(x, weight, bias):
    """x: (N, D, H, W) f32; weight: (3, 3) f32; bias: (1,) f32 -> (N, D, H, W) f32."""
    N, D, H, W = x.shape
    nd, HW = N * D, H * W
    x_flat = x.reshape(nd, HW)                  # free: contiguous reshape, no HBM pass

    # Tiny (9, H*W) coefficient table: weight folded with per-tap validity
    # masks (computed once per call in XLA; negligible size/cost).
    f = jnp.arange(HW, dtype=jnp.int32)
    hh = f // W
    ww = f % W
    rows = []
    for i in range(3):                          # di = i - 1 (cross-correlation)
        for j in range(3):                      # dj = j - 1
            di, dj = i - 1, j - 1
            valid = ((hh + di >= 0) & (hh + di < H) &
                     (ww + dj >= 0) & (ww + dj < W))
            rows.append(jnp.where(valid, weight[i, j], 0.0))
    coeff = jnp.stack(rows, axis=0).astype(jnp.float32)        # (9, HW)

    # Scratch layout: zero halo | payload (lane-aligned) | zero halo.
    PAD = ((W + 1 + 127) // 128) * 128
    L = PAD + HW + (W + 1)

    # --- VMEM-budget-driven choice of how many (H, W) planes per grid step ---
    try:
        cap = int(getattr(pltpu.get_tpu_info(), "vmem_capacity_bytes"))
    except Exception:
        cap = 64 * 1024 * 1024                  # conservative (v7x per-core VMEM)
    vmem_limit = int(max(32 * 1024 * 1024,
                         min(int(cap * 0.75), 112 * 1024 * 1024)))
    budget = int(0.55 * vmem_limit)

    HW_pad = ((HW + 127) // 128) * 128
    L_pad = ((L + 127) // 128) * 128

    def footprint(nb):
        nb_pad = ((nb + 7) // 8) * 8
        io = 2 * 2 * nb_pad * HW_pad * 4        # in + out blocks, double buffered
        scratch = nb_pad * L_pad * 4            # persistent scratch
        coeff_b = 2 * 16 * HW_pad * 4           # small resident coeff table
        return io + scratch + coeff_b

    # Candidate block heights: divisors of nd that satisfy the (8, 128) rule.
    cands = sorted({d for d in range(1, nd + 1)
                    if nd % d == 0 and (d % 8 == 0 or d == nd)})
    fitting = [d for d in cands if footprint(d) <= budget] or [cands[0]]
    nb = fitting[-1]
    multi = [d for d in fitting if nd // d >= 2]
    if nd // nb < 2 and multi:
        nb = multi[-1]                          # keep >=2 steps for v7x megacore
    # TODO(synk): add an H-tiled grid axis (halo fetched via the index_map) for
    # extreme H*W where even the smallest nb block exceeds the VMEM budget.

    grid = (nd // nb,)
    kernel = functools.partial(_stencil3x3_kernel, H=H, W=W, PAD=PAD)

    out = pl.pallas_call(
        kernel,
        out_shape=jax.ShapeDtypeStruct((nd, HW), jnp.float32),
        grid_spec=pltpu.PrefetchScalarGridSpec(
            num_scalar_prefetch=0,
            grid=grid,
            in_specs=[
                pl.BlockSpec(memory_space=pltpu.MemorySpace.SMEM),   # bias (1,)
                pl.BlockSpec((9, HW), lambda i: (0, 0)),             # coeff table
                pl.BlockSpec((nb, HW), lambda i: (i, 0)),            # input slab
            ],
            out_specs=pl.BlockSpec((nb, HW), lambda i: (i, 0)),
            scratch_shapes=[pltpu.VMEM((nb, L), jnp.float32)],
        ),
        compiler_params=pltpu.CompilerParams(
            dimension_semantics=("parallel",),
            vmem_limit_bytes=vmem_limit,
        ),
    )(bias, coeff, x_flat)

    return out.reshape(N, D, H, W)


def _reference_conv(x, weight, bias):
    """Pure-JAX reference (same math, lax conv) for a sanity check."""
    N, D, H, W = x.shape
    xs = x.reshape(N * D, 1, H, W)
    w = weight.reshape(1, 1, 3, 3)
    y = jax.lax.conv_general_dilated(
        xs, w, window_strides=(1, 1), padding=((1, 1), (1, 1)),
        dimension_numbers=("NCHW", "OIHW", "NCHW"))
    y = y + bias[0]
    return y.reshape(N, D, H, W)


if __name__ == "__main__":
    key = jax.random.PRNGKey(0)
    kx, kw, kb = jax.random.split(key, 3)

    N, D, H, W = 2, 4, 16, 16
    x = jax.random.normal(kx, (N, D, H, W), dtype=jnp.float32)

    # Deterministic parameter init (Conv3d(1,1,(1,3,3)) == 3x3 kernel + scalar bias).
    fan_in = 1 * 1 * 3 * 3
    bound = 1.0 / math.sqrt(fan_in)
    weight = jax.random.uniform(kw, (3, 3), minval=-bound, maxval=bound,
                                dtype=jnp.float32)
    bias = jax.random.uniform(kb, (1,), minval=-bound, maxval=bound,
                              dtype=jnp.float32)

    fwd = jax.jit(three_conv_forward)
    y = jax.block_until_ready(fwd(x, weight, bias))

    y_ref = _reference_conv(x, weight, bias)
    assert y.shape == (N, D, H, W)
    assert jnp.allclose(y, y_ref, atol=1e-5, rtol=1e-5)

    print("KERNEL_OK")
</pallas_src>

<mosaic_0001>
module attributes {stable_mosaic.version = 11 : i64} {
  func.func @_stencil3x3_kernel(%arg0: i32, %arg1: memref<1xf32, #tpu.memory_space<smem>>, %arg2: memref<9x256xf32, #tpu.memory_space<vmem>>, %arg3: memref<8x256xf32, #tpu.memory_space<vmem>>, %arg4: memref<8x256xf32, #tpu.memory_space<vmem>>, %arg5: memref<8x401xf32, #tpu.memory_space<vmem>>) attributes {dimension_semantics = [#tpu.dimension_semantics<parallel>], iteration_bounds = array<i64: 1>, scalar_prefetch = 0 : i64, scratch_operands = 1 : i64, tpu.core_type = #tpu.core_type<tc>, window_params = [{transform_indices = @transform_0, window_bounds = array<i64: 1>}, {pipeline_mode = #tpu.pipeline_mode<synchronous>, transform_indices = @transform_1, window_bounds = array<i64: 9, 256>}, {transform_indices = @transform_2, window_bounds = array<i64: 8, 256>}, {transform_indices = @transform_3, window_bounds = array<i64: 8, 256>}]} {
    %cst = arith.constant 0.000000e+00 : f32
    %0 = vector.broadcast %cst : f32 to vector<8x17xf32>
    %c0 = arith.constant 0 : index
    %c111 = arith.constant 111 : index
    %1 = vector.load %arg5[%c0, %c111] : memref<8x401xf32, #tpu.memory_space<vmem>>, vector<8x17xf32>
    tpu.vector_store %arg5[%c0, %c111], %0 {strides = array<i32>} : memref<8x401xf32, #tpu.memory_space<vmem>>, vector<8x17xf32>,
    %c0_0 = arith.constant 0 : index
    %c384 = arith.constant 384 : index
    %2 = vector.load %arg5[%c0_0, %c384] : memref<8x401xf32, #tpu.memory_space<vmem>>, vector<8x17xf32>
    tpu.vector_store %arg5[%c0_0, %c384], %0 {strides = array<i32>} : memref<8x401xf32, #tpu.memory_space<vmem>>, vector<8x17xf32>,
    %c0_1 = arith.constant 0 : index
    %c0_2 = arith.constant 0 : index
    %3 = vector.load %arg3[%c0_1, %c0_2] : memref<8x256xf32, #tpu.memory_space<vmem>>, vector<8x256xf32>
    %c0_3 = arith.constant 0 : index
    %c128 = arith.constant 128 : index
    %4 = vector.load %arg5[%c0_3, %c128] : memref<8x401xf32, #tpu.memory_space<vmem>>, vector<8x256xf32>
    tpu.vector_store %arg5[%c0_3, %c128], %3 {strides = array<i32>} : memref<8x401xf32, #tpu.memory_space<vmem>>, vector<8x256xf32>,
    %c0_4 = arith.constant 0 : index
    %5 = memref.load %arg1[%c0_4] : memref<1xf32, #tpu.memory_space<smem>>
    %6 = vector.broadcast %5 : f32 to vector<8x256xf32>
    %c0_5 = arith.constant 0 : index
    %c0_6 = arith.constant 0 : index
    %7 = vector.load %arg2[%c0_5, %c0_6] : memref<9x256xf32, #tpu.memory_space<vmem>>, vector<1x256xf32>
    %c0_7 = arith.constant 0 : index
    %c111_8 = arith.constant 111 : index
    %8 = vector.load %arg5[%c0_7, %c111_8] : memref<8x401xf32, #tpu.memory_space<vmem>>, vector<8x256xf32>
    %9 = vector.broadcast %7 : vector<1x256xf32> to vector<8x256xf32>
    %10 = arith.mulf %9, %8 : vector<8x256xf32>
    %11 = arith.addf %6, %10 : vector<8x256xf32>
    %c1 = arith.constant 1 : index
    %c0_9 = arith.constant 0 : index
    %12 = vector.load %arg2[%c1, %c0_9] : memref<9x256xf32, #tpu.memory_space<vmem>>, vector<1x256xf32>
    %c0_10 = arith.constant 0 : index
    %c112 = arith.constant 112 : index
    %13 = vector.load %arg5[%c0_10, %c112] : memref<8x401xf32, #tpu.memory_space<vmem>>, vector<8x256xf32>
    %14 = vector.broadcast %12 : vector<1x256xf32> to vector<8x256xf32>
    %15 = arith.mulf %14, %13 : vector<8x256xf32>
    %16 = arith.addf %11, %15 : vector<8x256xf32>
    %c2 = arith.constant 2 : index
    %c0_11 = arith.constant 0 : index
    %17 = vector.load %arg2[%c2, %c0_11] : memref<9x256xf32, #tpu.memory_space<vmem>>, vector<1x256xf32>
    %c0_12 = arith.constant 0 : index
    %c113 = arith.constant 113 : index
    %18 = vector.load %arg5[%c0_12, %c113] : memref<8x401xf32, #tpu.memory_space<vmem>>, vector<8x256xf32>
    %19 = vector.broadcast %17 : vector<1x256xf32> to vector<8x256xf32>
    %20 = arith.mulf %19, %18 : vector<8x256xf32>
    %21 = arith.addf %16, %20 : vector<8x256xf32>
    %c3 = arith.constant 3 : index
    %c0_13 = arith.constant 0 : index
    %22 = vector.load %arg2[%c3, %c0_13] : memref<9x256xf32, #tpu.memory_space<vmem>>, vector<1x256xf32>
    %c0_14 = arith.constant 0 : index
    %c127 = arith.constant 127 : index
    %23 = vector.load %arg5[%c0_14, %c127] : memref<8x401xf32, #tpu.memory_space<vmem>>, vector<8x256xf32>
    %24 = vector.broadcast %22 : vector<1x256xf32> to vector<8x256xf32>
    %25 = arith.mulf %24, %23 : vector<8x256xf32>
    %26 = arith.addf %21, %25 : vector<8x256xf32>
    %c4 = arith.constant 4 : index
    %c0_15 = arith.constant 0 : index
    %27 = vector.load %arg2[%c4, %c0_15] : memref<9x256xf32, #tpu.memory_space<vmem>>, vector<1x256xf32>
    %c0_16 = arith.constant 0 : index
    %c128_17 = arith.constant 128 : index
    %28 = vector.load %arg5[%c0_16, %c128_17] : memref<8x401xf32, #tpu.memory_space<vmem>>, vector<8x256xf32>
    %29 = vector.broadcast %27 : vector<1x256xf32> to vector<8x256xf32>
    %30 = arith.mulf %29, %28 : vector<8x256xf32>
    %31 = arith.addf %26, %30 : vector<8x256xf32>
    %c5 = arith.constant 5 : index
    %c0_18 = arith.constant 0 : index
    %32 = vector.load %arg2[%c5, %c0_18] : memref<9x256xf32, #tpu.memory_space<vmem>>, vector<1x256xf32>
    %c0_19 = arith.constant 0 : index
    %c129 = arith.constant 129 : index
    %33 = vector.load %arg5[%c0_19, %c129] : memref<8x401xf32, #tpu.memory_space<vmem>>, vector<8x256xf32>
    %34 = vector.broadcast %32 : vector<1x256xf32> to vector<8x256xf32>
    %35 = arith.mulf %34, %33 : vector<8x256xf32>
    %36 = arith.addf %31, %35 : vector<8x256xf32>
    %c6 = arith.constant 6 : index
    %c0_20 = arith.constant 0 : index
    %37 = vector.load %arg2[%c6, %c0_20] : memref<9x256xf32, #tpu.memory_space<vmem>>, vector<1x256xf32>
    %c0_21 = arith.constant 0 : index
    %c143 = arith.constant 143 : index
    %38 = vector.load %arg5[%c0_21, %c143] : memref<8x401xf32, #tpu.memory_space<vmem>>, vector<8x256xf32>
    %39 = vector.broadcast %37 : vector<1x256xf32> to vector<8x256xf32>
    %40 = arith.mulf %39, %38 : vector<8x256xf32>
    %41 = arith.addf %36, %40 : vector<8x256xf32>
    %c7 = arith.constant 7 : index
    %c0_22 = arith.constant 0 : index
    %42 = vector.load %arg2[%c7, %c0_22] : memref<9x256xf32, #tpu.memory_space<vmem>>, vector<1x256xf32>
    %c0_23 = arith.constant 0 : index
    %c144 = arith.constant 144 : index
    %43 = vector.load %arg5[%c0_23, %c144] : memref<8x401xf32, #tpu.memory_space<vmem>>, vector<8x256xf32>
    %44 = vector.broadcast %42 : vector<1x256xf32> to vector<8x256xf32>
    %45 = arith.mulf %44, %43 : vector<8x256xf32>
    %46 = arith.addf %41, %45 : vector<8x256xf32>
    %c8 = arith.constant 8 : index
    %c0_24 = arith.constant 0 : index
    %47 = vector.load %arg2[%c8, %c0_24] : memref<9x256xf32, #tpu.memory_space<vmem>>, vector<1x256xf32>
    %c0_25 = arith.constant 0 : index
    %c145 = arith.constant 145 : index
    %48 = vector.load %arg5[%c0_25, %c145] : memref<8x401xf32, #tpu.memory_space<vmem>>, vector<8x256xf32>
    %49 = vector.broadcast %47 : vector<1x256xf32> to vector<8x256xf32>
    %50 = arith.mulf %49, %48 : vector<8x256xf32>
    %51 = arith.addf %46, %50 : vector<8x256xf32>
    %c0_26 = arith.constant 0 : index
    %c0_27 = arith.constant 0 : index
    %52 = vector.load %arg4[%c0_26, %c0_27] : memref<8x256xf32, #tpu.memory_space<vmem>>, vector<8x256xf32>
    tpu.vector_store %arg4[%c0_26, %c0_27], %51 {strides = array<i32>} : memref<8x256xf32, #tpu.memory_space<vmem>>, vector<8x256xf32>,
    return
  }
  func.func @transform_0(%arg0: i32) -> i32 {
    %c0_i32 = arith.constant 0 : i32
    %c0_i32_0 = arith.constant 0 : i32
    return %c0_i32 : i32
  }
  func.func @transform_1(%arg0: i32) -> (i32, i32) {
    %c0_i32 = arith.constant 0 : i32
    %c0_i32_0 = arith.constant 0 : i32
    %c0_i32_1 = arith.constant 0 : i32
    return %c0_i32, %c0_i32_0 : i32, i32
  }
  func.func @transform_2(%arg0: i32) -> (i32, i32) {
    %c0_i32 = arith.constant 0 : i32
    %c0_i32_0 = arith.constant 0 : i32
    return %arg0, %c0_i32 : i32, i32
  }
  func.func @transform_3(%arg0: i32) -> (i32, i32) {
    %c0_i32 = arith.constant 0 : i32
    %c0_i32_0 = arith.constant 0 : i32
    return %arg0, %c0_i32 : i32, i32
  }
}

</mosaic_0001>

<bundles_post_ra>
// kernel: three_conv_forward.1
= control target key start
LH: loop header
LB: loop body
LE: loop exit
PB: predicated region body
PF: predicated region fallthrough
CT: control target
= control target key end

     0   :  { %vm15_vm0 = vcmask 1048440   ;;  %vm17_vm1 = vcmask 138240   ;;  %v295_v0 = vmov 0.0   ;;  %s296_s16 = smov 16   ;;  %s297_s17 = smov 17   ;;  %v30_v9 = vlaneseq  ;;  %s421_s2 = inlined_call_operand.vmem [shape: f32[8,256], index: 2, kind: input, shape index: {}]   ;;  %s422_s1 = inlined_call_operand.vmem [shape: f32[9,256], index: 1, kind: input, shape index: {}]   ;;  %s423_s0 = inlined_call_operand.<no memory space> [shape: f32[1], index: 0, kind: input, shape index: {}]   ;;  %s424_s3 = inlined_call_operand.vmem [shape: f32[8,256], index: 3, kind: output, shape index: {}]  }
   0x1   :  { %16 = vst.msk [vmem:[#allocation2] sm:$0xff] %vm15_vm0, %v295_v0  ;;  %v327_v1 = vld [vmem:[%s421_s2 + $0x8] sm:$0xff]  ;;  %v332_v2 = vld [vmem:[%s421_s2] sm:$0xff]  ;;  %s298_s18 = smov 15   ;;  %s299_s2 = smov 1   ;;  %vm76_vm2 = vcmask 130048   ;;  %v24_v36 = vstv %s423_s0 }
   0x2   :  { %18 = vst.msk [vmem:[#allocation2 + $0x18] sm:$0xff] %vm17_vm1, %v295_v0  ;;  %s300_s19 = smov 127   ;;  %s301_s20 = smov 113   ;;  %v31_v12 = vshrl.u32 %v30_v9, 7  ;;  %vm104_vm3 = vcmask 121856   ;;  %vm132_vm4 = vcmask 7168  }
   0x3   :  { %s302_s21 = smov 112   ;;  %s303_s22 = smov 111   ;;  %v25_v18 = vld [vmem:[%s422_s1] ss:$8 sm:$0x3]  ;;  %vm179_vm5 = vcmask 1039360  }
   0x4   :  { %v351_v15 = vsub.s32 0, %v31_v12  ;;  %v356_v19 = vsub.s32 1, %v31_v12  ;;  %v278_v20 = vld [vmem:[%s422_s1 + $0x1] ss:$8 sm:$0x3]  ;;  %vm207_vm6 = vcmask 924672  }
   0x5   :  { %v279_v25 = vld [vmem:[%s422_s1 + $0x2] ss:$8 sm:$0x3]  ;;  %v280_v30 = vld [vmem:[%s422_s1 + $0x3] ss:$8 sm:$0x3] }
   0x6   :  { %v33_v21 = vrot.slane %v25_v18, %v351_v15  ;;  %v37_v26 = vrot.slane %v25_v18, %v356_v19  ;;  %v63_v27 = vrot.slane %v278_v20, %v351_v15  ;;  %v67_v32 = vrot.slane %v278_v20, %v356_v19  ;;  %v281_v43 = vld [vmem:[%s422_s1 + $0x4] ss:$8 sm:$0x3]  ;;  %v282_v58 = vld [vmem:[%s422_s1 + $0x5] ss:$8 sm:$0x3] }
   0x7   :  { %v91_v33 = vrot.slane %v279_v25, %v351_v15  ;;  %v95_v41 = vrot.slane %v279_v25, %v356_v19  ;;  %v119_v42 = vrot.slane %v280_v30, %v351_v15  ;;  %v123_v49 = vrot.slane %v280_v30, %v356_v19  ;;  %v284_v9 = vld [vmem:[%s422_s1 + $0x7] ss:$8 sm:$0x3] }
   0x8   :  { %v26_v3 = vld [vmem:[#allocation2] sm:$0xff]  ;;  %v147_v53 = vrot.slane %v281_v43, %v351_v15  ;;  %v151_v59 = vrot.slane %v281_v43, %v356_v19  ;;  %vm235_vm7 = vcmask 916480   ;;  %v226_v25 = vrot.slane %v284_v9, %v356_v19 }
   0x9   :  { %70 = vrot.lane.b32.xlu1 %v26_v3, %s296_s16  ;;  %43 = vrot.lane.b32.xlu0 %v26_v3, %s297_s17  ;;  %v160_v4 = vld [vmem:[#allocation2 + $0x18] sm:$0xff]  ;;  %vm263_vm8 = vcmask 908288  }
   0xd   :  { %47 = vrot.lane.b32.xlu1 %v327_v1, %s297_s17  ;;  %45 = vrot.lane.b32.xlu0 %v332_v2, %s297_s17 }
  0x11   :  { %74 = vrot.lane.b32.xlu1 %v327_v1, %s296_s16  ;;  %72 = vrot.lane.b32.xlu0 %v332_v2, %s296_s16 }
  0x15   :  { %100 = vrot.lane.b32.xlu1 %v332_v2, %s298_s18  ;;  %98 = vrot.lane.b32.xlu0 %v26_v3, %s298_s18 }
  0x19   :  { %126 = vrot.lane.b32.xlu1 %v26_v3, %s299_s2  ;;  %102 = vrot.lane.b32.xlu0 %v327_v1, %s298_s18  ;;  %v154_v3 = vmul.f32 %v147_v53, %v332_v2 }
  0x1d   :  { %130 = vrot.lane.b32.xlu1 %v327_v1, %s299_s2  ;;  %128 = vrot.lane.b32.xlu0 %v332_v2, %s299_s2 }
  0x21   :  { %175 = vrot.lane.b32.xlu1 %v327_v1, %s300_s19  ;;  %173 = vrot.lane.b32.xlu0 %v332_v2, %s300_s19 }
  0x25   :  { %201 = vrot.lane.b32.xlu1 %v332_v2, %s301_s20  ;;  %177 = vrot.lane.b32.xlu0 %v160_v4, %s300_s19 }
  0x29   :  { %205 = vrot.lane.b32.xlu1 %v160_v4, %s301_s20  ;;  %203 = vrot.lane.b32.xlu0 %v327_v1, %s301_s20 }
  0x2d   :  { %231 = vrot.lane.b32.xlu1 %v327_v1, %s302_s21  ;;  %229 = vrot.lane.b32.xlu0 %v332_v2, %s302_s21 }
  0x31   :  { %257 = vrot.lane.b32.xlu1 %v332_v2, %s303_s22  ;;  %233 = vrot.lane.b32.xlu0 %v160_v4, %s302_s21 }
  0x35   :  { %261 = vrot.lane.b32.xlu1 %v160_v4, %s303_s22  ;;  %259 = vrot.lane.b32.xlu0 %v327_v1, %s303_s22  ;;  %v165_v4 = vrot.slane %v282_v58, %v351_v15 }
  0x7b   :  { %v71_v5 = vpop.permute.xlu1 %70  ;;  %v44_v6 = vpop.permute.xlu0 %43 }
  0x7f   :  { %v48_v7 = vpop.permute.xlu1 %47  ;;  %v46_v8 = vpop.permute.xlu0 %45 }
  0x80   :  { %v49_v24 = vsel %vm17_vm1, %v44_v6, %v46_v8  ;;  %v50_v28 = vsel %vm17_vm1, %v46_v8, %v48_v7  ;;  %v169_v8 = vrot.slane %v282_v58, %v356_v19 }
  0x81   :  { %v53_v31 = vmul.f32 %v49_v24, %v33_v21  ;;  %v54_v39 = vmul.f32 %v50_v28, %v37_v26  ;;  %v222_v21 = vrot.slane %v284_v9, %v351_v15 }
  0x83   :  { %v75_v10 = vpop.permute.xlu1 %74  ;;  %v73_v11 = vpop.permute.xlu0 %72  ;;  %v55_v46 = vadd.f32 %v53_v31, %v24_v36  ;;  %v56_v54 = vadd.f32 %v54_v39, %v24_v36 }
  0x84   :  { %v77_v29 = vsel %vm76_vm2, %v71_v5, %v73_v11  ;;  %v78_v37 = vsel %vm76_vm2, %v73_v11, %v75_v10  ;;  %v283_v5 = vld [vmem:[%s422_s1 + $0x6] ss:$8 sm:$0x3]  ;;  %v155_v11 = vmul.f32 %v151_v59, %v327_v1  ;;  %v285_v1 = vld [vmem:[%s422_s1 + $0x10] ss:$8 sm:$0x3] }
  0x85   :  { %v81_v40 = vmul.f32 %v77_v29, %v63_v27  ;;  %v82_v47 = vmul.f32 %v78_v37, %v67_v32 }
  0x87   :  { %v101_v13 = vpop.permute.xlu1 %100  ;;  %v99_v14 = vpop.permute.xlu0 %98  ;;  %v83_v55 = vadd.f32 %v81_v40, %v55_v46  ;;  %v84_v60 = vadd.f32 %v82_v47, %v56_v54 }
  0x88   :  { %v105_v38 = vsel %vm104_vm3, %v99_v14, %v101_v13  ;;  %v198_v14 = vrot.slane %v283_v5, %v356_v19 }
  0x89   :  { %v109_v48 = vmul.f32 %v105_v38, %v91_v33  ;;  %v250_v33 = vrot.slane %v285_v1, %v351_v15 }
  0x8b   :  { %v127_v16 = vpop.permute.xlu1 %126  ;;  %v103_v17 = vpop.permute.xlu0 %102  ;;  %v111_v61 = vadd.f32 %v109_v48, %v83_v55 }
  0x8c   :  { %v106_v44 = vsel %vm104_vm3, %v101_v13, %v103_v17  ;;  %v194_v13 = vrot.slane %v283_v5, %v351_v15 }
  0x8d   :  { %v110_v56 = vmul.f32 %v106_v44, %v95_v41 }
  0x8f   :  { %v131_v22 = vpop.permute.xlu1 %130  ;;  %v129_v23 = vpop.permute.xlu0 %128  ;;  %v112_v6 = vadd.f32 %v110_v56, %v84_v60 }
  0x90   :  { %v133_v45 = vsel %vm132_vm4, %v127_v16, %v129_v23  ;;  %v134_v52 = vsel %vm132_vm4, %v129_v23, %v131_v22 }
  0x91   :  { %v137_v57 = vmul.f32 %v133_v45, %v119_v42  ;;  %v138_v62 = vmul.f32 %v134_v52, %v123_v49 }
  0x93   :  { %v176_v34 = vpop.permute.xlu1 %175  ;;  %v174_v35 = vpop.permute.xlu0 %173  ;;  %v139_v7 = vadd.f32 %v137_v57, %v111_v61  ;;  %v140_v2 = vadd.f32 %v138_v62, %v112_v6 }
  0x94   :  { %v180_v10 = vsel %vm179_vm5, %v174_v35, %v176_v34 }
  0x95   :  { %v156_v22 = vadd.f32 %v154_v3, %v139_v7  ;;  %v184_v23 = vmul.f32 %v180_v10, %v165_v4  ;;  %v157_v27 = vadd.f32 %v155_v11, %v140_v2 }
  0x97   :  { %v202_v50 = vpop.permute.xlu1 %201  ;;  %v178_v51 = vpop.permute.xlu0 %177  ;;  %v186_v35 = vadd.f32 %v184_v23, %v156_v22 }
  0x98   :  { %v181_v12 = vsel %vm179_vm5, %v176_v34, %v178_v51  ;;  %v254_v34 = vrot.slane %v285_v1, %v356_v19 }
  0x99   :  { %v185_v24 = vmul.f32 %v181_v12, %v169_v8 }
  0x9b   :  { %v206_v63 = vpop.permute.xlu1 %205  ;;  %v204_v0 = vpop.permute.xlu0 %203  ;;  %v187_v36 = vadd.f32 %v185_v24, %v157_v27 }
  0x9c   :  { %v208_v18 = vsel %vm207_vm6, %v202_v50, %v204_v0  ;;  %v209_v20 = vsel %vm207_vm6, %v204_v0, %v206_v63 }
  0x9d   :  { %v212_v28 = vmul.f32 %v208_v18, %v194_v13  ;;  %v213_v29 = vmul.f32 %v209_v20, %v198_v14 }
  0x9f   :  { %v232_v16 = vpop.permute.xlu1 %231  ;;  %v230_v17 = vpop.permute.xlu0 %229  ;;  %v214_v39 = vadd.f32 %v212_v28, %v186_v35  ;;  %v215_v40 = vadd.f32 %v213_v29, %v187_v36 }
  0xa0   :  { %v236_v26 = vsel %vm235_vm7, %v230_v17, %v232_v16 }
  0xa1   :  { %v240_v37 = vmul.f32 %v236_v26, %v222_v21 }
  0xa3   :  { %v258_v30 = vpop.permute.xlu1 %257  ;;  %v234_v31 = vpop.permute.xlu0 %233  ;;  %v242_v45 = vadd.f32 %v240_v37, %v214_v39 }
  0xa4   :  { %v237_v32 = vsel %vm235_vm7, %v232_v16, %v234_v31 }
  0xa5   :  { %v241_v38 = vmul.f32 %v237_v32, %v226_v25 }
  0xa7   :  { %v262_v41 = vpop.permute.xlu1 %261  ;;  %v260_v42 = vpop.permute.xlu0 %259  ;;  %v243_v46 = vadd.f32 %v241_v38, %v215_v40 }
  0xa8   :  { %v264_v43 = vsel %vm263_vm8, %v258_v30, %v260_v42  ;;  %v265_v44 = vsel %vm263_vm8, %v260_v42, %v262_v41 }
  0xa9   :  { %v268_v47 = vmul.f32 %v264_v43, %v250_v33  ;;  %v269_v48 = vmul.f32 %v265_v44, %v254_v34 }
  0xab   :  { %v270_v49 = vadd.f32 %v268_v47, %v242_v45  ;;  %v271_v50 = vadd.f32 %v269_v48, %v243_v46 }
  0xad   :  { %272 = vst [vmem:[%s424_s3] sm:$0xff] %v270_v49  ;;  %273 = vst [vmem:[%s424_s3 + $0x8] sm:$0xff] %v271_v50 }

</bundles_post_ra>
